<compile_context>
chip_gen: v7x
topology: tpu7x:2x2x1
jax: 0.10.0
libtpu: 0.0.40
codegen_flags: <defaults>
</compile_context>

<pallas_src>
import jax
import jax.numpy as jnp
from jax.experimental import pallas as pl
from jax.experimental.pallas import tpu as pltpu

# ----------------------------- config ---------------------------------------
B, C_IN, H, W = 2, 4, 16, 16          # input (NCHW): [2, 4, 16, 16]
C_OUT = 32                            # backbone out_features
HIDDEN = 32                           # head hidden size
NUM_CLASSES = 10
KH = KW = 3
K_IM2COL = KH * KW * C_IN             # 36

LANE = 128                            # lane-dense width for slabs / output
B_PAD = 8                             # output sublane padding (full (8,128) tile)
W1_ROW = 48                           # head weight row offset in the weight slab
W2_ROW = 80                           # classifier weight row offset
W_SLAB_ROWS = 112                     # total slab rows (multiple of 16 for bf16)
INV_HW = 1.0 / float(H * W)           # GAP scale, applied in f32 in-kernel


# ----------------------------- kernel ---------------------------------------
def simplenet_kernel(p_ref, pool_ref, w_ref, b_ref, out_ref):
    """Fused conv(im2col GEMM) + bias + ReLU + GAP(matmul) + head + classifier.

    p_ref   : (B*H*W, 36)        bf16 im2col patches
    pool_ref: (B_PAD, B*H*W)     bf16 block-diagonal selector (entries 1.0)
    w_ref   : (112, 128)         bf16 weight slab
                rows  0:36,  cols 0:32  -> conv weight (kh*kw*cin, Cout)
                rows 48:80,  cols 0:32  -> head weight (Cout, HIDDEN)
                rows 80:112, cols 0:128 -> classifier weight (HIDDEN, 128 lane-padded)
    b_ref   : (8, 128)           f32 bias slab (row0 conv, row1 head, row2 classifier)
    out_ref : (B_PAD, 128)       f32 padded logits (full-tile unmasked store)
    """
    cw = w_ref[0:K_IM2COL, 0:C_OUT]                      # static ref slices: views
    w1 = w_ref[W1_ROW:W1_ROW + C_OUT, 0:HIDDEN]
    w2 = w_ref[W2_ROW:W2_ROW + HIDDEN, :]
    cb = b_ref[0:1, 0:C_OUT]
    b1 = b_ref[1:2, 0:HIDDEN]
    b2 = b_ref[2:3, :]

    # backbone conv3x3 (same padding) as one MXU GEMM, bias + ReLU in f32
    conv = jnp.dot(p_ref[...], cw, preferred_element_type=jnp.float32)
    conv = jnp.maximum(conv + cb, 0.0)                   # (B*H*W, Cout)

    # global average pool as block-diagonal matmul; 1/(H*W) applied in f32
    feat = jnp.dot(pool_ref[...], conv.astype(jnp.bfloat16),
                   preferred_element_type=jnp.float32) * INV_HW   # (B_PAD, Cout)

    # head: Linear + ReLU
    hdn = jnp.dot(feat.astype(jnp.bfloat16), w1,
                  preferred_element_type=jnp.float32) + b1
    hdn = jnp.maximum(hdn, 0.0)                          # (B_PAD, HIDDEN)

    # classifier: Linear (lane-padded to 128) -> full-tile store
    out_ref[...] = jnp.dot(hdn.astype(jnp.bfloat16), w2,
                           preferred_element_type=jnp.float32) + b2


# ----------------------------- one-time param packing ------------------------
def pack_params(params):
    """Pack SimpleNet params into (weight slab, bias slab, pool selector).

    Runs ONCE per parameter set, outside the per-forward jit path."""
    cw, cb, w1, b1, w2, b2 = params

    w_slab = jnp.zeros((W_SLAB_ROWS, LANE), jnp.float32)
    w_slab = w_slab.at[0:K_IM2COL, 0:C_OUT].set(cw.reshape(K_IM2COL, C_OUT))
    w_slab = w_slab.at[W1_ROW:W1_ROW + C_OUT, 0:HIDDEN].set(w1)
    w_slab = w_slab.at[W2_ROW:W2_ROW + HIDDEN, 0:NUM_CLASSES].set(w2)
    w_slab = w_slab.astype(jnp.bfloat16)

    b_slab = jnp.zeros((B_PAD, LANE), jnp.float32)
    b_slab = b_slab.at[0, 0:C_OUT].set(cb.reshape(-1))
    b_slab = b_slab.at[1, 0:HIDDEN].set(b1.reshape(-1))
    b_slab = b_slab.at[2, 0:NUM_CLASSES].set(b2.reshape(-1))

    # block-diagonal GAP selector, entries 1.0 (exact in bf16); padded to 8 rows
    pool_core = jnp.repeat(jnp.eye(B, dtype=jnp.float32), H * W, axis=1)  # (B, B*H*W)
    pool = jnp.zeros((B_PAD, B * H * W), jnp.float32).at[:B].set(pool_core)
    pool = pool.astype(jnp.bfloat16)

    return w_slab, b_slab, pool


# ----------------------------- forward wrapper --------------------------------
@jax.jit
def simplenet_forward(x_nchw, w_slab, b_slab, pool):
    """x_nchw: float32 [B, Cin, H, W] (torch layout). Returns logits [B, NUM_CLASSES]."""
    # per-call XLA glue: NCHW->NHWC, zero-pad, im2col, bf16 cast of activations
    x = jnp.transpose(x_nchw, (0, 2, 3, 1)).astype(jnp.float32)
    xp = jnp.pad(x, ((0, 0), (1, 1), (1, 1), (0, 0)))
    patches = jnp.stack(
        [xp[:, kh:kh + H, kw:kw + W, :] for kh in range(KH) for kw in range(KW)],
        axis=3)                                               # (B,H,W,9,Cin)
    patches = patches.reshape(B * H * W, K_IM2COL).astype(jnp.bfloat16)

    vmem = pl.BlockSpec(memory_space=pltpu.MemorySpace.VMEM)
    logits_pad = pl.pallas_call(
        simplenet_kernel,
        out_shape=jax.ShapeDtypeStruct((B_PAD, LANE), jnp.float32),
        in_specs=[vmem] * 4,
        out_specs=vmem,
        cost_estimate=pl.CostEstimate(
            flops=1_523_712, transcendentals=0, bytes_accessed=81_920),
    )(patches, pool, w_slab, b_slab)

    return logits_pad[:B, :NUM_CLASSES]


# ----------------------------- param init ------------------------------------
def init_params(key):
    ks = jax.random.split(key, 6)
    cw = jax.random.normal(ks[0], (KH, KW, C_IN, C_OUT), jnp.float32) * 0.1
    cb = jax.random.normal(ks[1], (1, C_OUT), jnp.float32) * 0.01
    w1 = jax.random.normal(ks[2], (C_OUT, HIDDEN), jnp.float32) * 0.1
    b1 = jax.random.normal(ks[3], (1, HIDDEN), jnp.float32) * 0.01
    w2 = jax.random.normal(ks[4], (HIDDEN, NUM_CLASSES), jnp.float32) * 0.1
    b2 = jax.random.normal(ks[5], (1, NUM_CLASSES), jnp.float32) * 0.01
    return cw, cb, w1, b1, w2, b2


# ----------------------------- reference (pure JAX, f32) ----------------------
def simplenet_reference(x_nchw, params):
    cw, cb, w1, b1, w2, b2 = params
    x = jnp.transpose(x_nchw, (0, 2, 3, 1))
    f = jax.lax.conv_general_dilated(
        x, cw, window_strides=(1, 1), padding="SAME",
        dimension_numbers=("NHWC", "HWIO", "NHWC"))
    f = jnp.maximum(f + cb.reshape(1, 1, 1, -1), 0.0)
    f = jnp.mean(f, axis=(1, 2))                       # GAP -> (B, Cout)
    h = jnp.maximum(f @ w1 + b1, 0.0)                  # head
    return h @ w2 + b2                                 # classifier


# ----------------------------- main -------------------------------------------
if __name__ == "__main__":
    key = jax.random.PRNGKey(0)
    kx, kp = jax.random.split(key)
    x = jax.random.normal(kx, (B, C_IN, H, W), jnp.float32)   # NCHW input
    params = init_params(kp)

    packed = pack_params(params)          # one-time packing, outside per-call path

    y = simplenet_forward(x, *packed)
    y = jax.block_until_ready(y)

    y_ref = simplenet_reference(x, params)
    assert y.shape == (B, NUM_CLASSES)
    # bf16 MXU operands -> relaxed tolerance vs the f32 reference
    assert jnp.allclose(y, y_ref, atol=2e-2, rtol=2e-2), "mismatch vs JAX reference"

    print("KERNEL_OK")
</pallas_src>

<mosaic_0001>
module attributes {stable_mosaic.version = 11 : i64} {
  func.func @simplenet_kernel(%arg0: memref<512x36xbf16, #tpu.memory_space<vmem>>, %arg1: memref<8x512xbf16, #tpu.memory_space<vmem>>, %arg2: memref<112x128xbf16, #tpu.memory_space<vmem>>, %arg3: memref<8x128xf32, #tpu.memory_space<vmem>>, %arg4: memref<8x128xf32, #tpu.memory_space<vmem>>) attributes {dimension_semantics = [], scalar_prefetch = 0 : i64, scratch_operands = 0 : i64, tpu.core_type = #tpu.core_type<tc>} {
    %c0 = arith.constant 0 : index
    %c0_0 = arith.constant 0 : index
    %0 = vector.load %arg2[%c0, %c0_0] : memref<112x128xbf16, #tpu.memory_space<vmem>>, vector<36x32xbf16>
    %c48 = arith.constant 48 : index
    %c0_1 = arith.constant 0 : index
    %1 = vector.load %arg2[%c48, %c0_1] : memref<112x128xbf16, #tpu.memory_space<vmem>>, vector<32x32xbf16>
    %c80 = arith.constant 80 : index
    %c0_2 = arith.constant 0 : index
    %2 = vector.load %arg2[%c80, %c0_2] : memref<112x128xbf16, #tpu.memory_space<vmem>>, vector<32x128xbf16>
    %c0_3 = arith.constant 0 : index
    %c0_4 = arith.constant 0 : index
    %3 = vector.load %arg3[%c0_3, %c0_4] : memref<8x128xf32, #tpu.memory_space<vmem>>, vector<1x32xf32>
    %c1 = arith.constant 1 : index
    %c0_5 = arith.constant 0 : index
    %4 = vector.load %arg3[%c1, %c0_5] : memref<8x128xf32, #tpu.memory_space<vmem>>, vector<1x32xf32>
    %c2 = arith.constant 2 : index
    %c0_6 = arith.constant 0 : index
    %5 = vector.load %arg3[%c2, %c0_6] : memref<8x128xf32, #tpu.memory_space<vmem>>, vector<1x128xf32>
    %c0_7 = arith.constant 0 : index
    %c0_8 = arith.constant 0 : index
    %6 = vector.load %arg0[%c0_7, %c0_8] : memref<512x36xbf16, #tpu.memory_space<vmem>>, vector<512x36xbf16>
    %cst = arith.constant dense<0.000000e+00> : vector<512x32xf32>
    %7 = tpu.matmul %6, %0, %cst {dimension_numbers = #tpu.dot_dimension_numbers<[1], [0], [0], [1], [0, 0, 1, 1], [], []>} : vector<512x36xbf16>, vector<36x32xbf16>, vector<512x32xf32> -> vector<512x32xf32>
    %8 = vector.broadcast %3 : vector<1x32xf32> to vector<512x32xf32>
    %9 = arith.addf %7, %8 : vector<512x32xf32>
    %cst_9 = arith.constant 0.000000e+00 : f32
    %10 = vector.broadcast %cst_9 : f32 to vector<512x32xf32>
    %11 = arith.maximumf %9, %10 : vector<512x32xf32>
    %c0_10 = arith.constant 0 : index
    %c0_11 = arith.constant 0 : index
    %12 = vector.load %arg1[%c0_10, %c0_11] : memref<8x512xbf16, #tpu.memory_space<vmem>>, vector<8x512xbf16>
    %13 = arith.truncf %11 : vector<512x32xf32> to vector<512x32xbf16>
    %cst_12 = arith.constant dense<0.000000e+00> : vector<8x32xf32>
    %14 = tpu.matmul %12, %13, %cst_12 {dimension_numbers = #tpu.dot_dimension_numbers<[1], [0], [0], [1], [0, 0, 1, 1], [], []>} : vector<8x512xbf16>, vector<512x32xbf16>, vector<8x32xf32> -> vector<8x32xf32>
    %cst_13 = arith.constant 3.906250e-03 : f32
    %15 = vector.broadcast %cst_13 : f32 to vector<8x32xf32>
    %16 = arith.mulf %14, %15 : vector<8x32xf32>
    %17 = arith.truncf %16 : vector<8x32xf32> to vector<8x32xbf16>
    %cst_14 = arith.constant dense<0.000000e+00> : vector<8x32xf32>
    %18 = tpu.matmul %17, %1, %cst_14 {dimension_numbers = #tpu.dot_dimension_numbers<[1], [0], [0], [1], [0, 0, 1, 1], [], []>} : vector<8x32xbf16>, vector<32x32xbf16>, vector<8x32xf32> -> vector<8x32xf32>
    %19 = vector.broadcast %4 : vector<1x32xf32> to vector<8x32xf32>
    %20 = arith.addf %18, %19 : vector<8x32xf32>
    %cst_15 = arith.constant 0.000000e+00 : f32
    %21 = vector.broadcast %cst_15 : f32 to vector<8x32xf32>
    %22 = arith.maximumf %20, %21 : vector<8x32xf32>
    %23 = arith.truncf %22 : vector<8x32xf32> to vector<8x32xbf16>
    %cst_16 = arith.constant dense<0.000000e+00> : vector<8x128xf32>
    %24 = tpu.matmul %23, %2, %cst_16 {dimension_numbers = #tpu.dot_dimension_numbers<[1], [0], [0], [1], [0, 0, 1, 1], [], []>} : vector<8x32xbf16>, vector<32x128xbf16>, vector<8x128xf32> -> vector<8x128xf32>
    %25 = vector.broadcast %5 : vector<1x128xf32> to vector<8x128xf32>
    %26 = arith.addf %24, %25 : vector<8x128xf32>
    %c0_17 = arith.constant 0 : index
    %c0_18 = arith.constant 0 : index
    %27 = vector.load %arg4[%c0_17, %c0_18] : memref<8x128xf32, #tpu.memory_space<vmem>>, vector<8x128xf32>
    tpu.vector_store %arg4[%c0_17, %c0_18], %26 {strides = array<i32>} : memref<8x128xf32, #tpu.memory_space<vmem>>, vector<8x128xf32>,
    return
  }
}

</mosaic_0001>

<bundles_post_ra>
// kernel: simplenet_forward.1
= control target key start
LH: loop header
LB: loop body
LE: loop exit
PB: predicated region body
PF: predicated region fallthrough
CT: control target
= control target key end

     0   :  { %vm277_vm0 = vcmask 293888   ;;  %vm374_vm1 = vcmask 1041408   ;;  %vm1292_vm2 = vmmov 0   ;;  %vm877_vm3 = vcmask 261120   ;;  %s1615_s2 = inlined_call_operand.vmem [shape: bf16[112,128], index: 2, kind: input, shape index: {}]   ;;  %s1616_s0 = inlined_call_operand.vmem [shape: bf16[512,36], index: 0, kind: input, shape index: {}]   ;;  %s1617_s1 = inlined_call_operand.vmem [shape: bf16[8,512], index: 1, kind: input, shape index: {}]   ;;  %s1618_s3 = inlined_call_operand.vmem [shape: f32[8,128], index: 3, kind: input, shape index: {}]   ;;  %s1619_s4 = inlined_call_operand.vmem [shape: f32[8,128], index: 4, kind: output, shape index: {}]  }
   0x1   :  { %v1248_v0 = vld [vmem:[%s1615_s2] sm:$0xff]   ;;  %v1249_v1 = vld [vmem:[%s1615_s2 + $0x8] sm:$0xff]   ;;  %v1250_v2 = vld [vmem:[%s1615_s2 + $0x10] ss:$0 sps:$4 sm:$0x33]  }
   0x2   :  { %1152 = vmatprep.subr.bf16.mxu0 %v1248_v0  ;;  %v1251_v3 = vld [vmem:[%s1616_s0] sm:$0xff]   ;;  %1238 = vmatprep.subr.bf16.mxu1 %v1248_v0  ;;  %v376_v4 = vsel %vm374_vm1, %v1250_v2, 0  ;;  %v1252_v5 = vld [vmem:[%s1616_s0 + $0x8] sm:$0xff]   ;;  %v1253_v6 = vld [vmem:[%s1616_s0 + $0x10] sm:$0xff]  }
   0x3   :  { %1153 = vmatpush3.bf16.msra.mxu0 %v1248_v0  ;;  %1241 = vmatpush3.bf16.msra.mxu1 %v1248_v0  ;;  %v1254_v7 = vld [vmem:[%s1616_s0 + $0x18] sm:$0xff]   ;;  %v1255_v8 = vld [vmem:[%s1616_s0 + $0x20] sm:$0xff]   ;;  %v1268_v10 = vld [vmem:[%s1616_s0 + $0xc8] sm:$0xff]  }
   0x4   :  { %1154 = vmatprep.subr.bf16.mxu0 %v1249_v1  ;;  %1158 = vmatprep.mubr.msk.bf16.mxu0 %vm277_vm0, %v1251_v3  ;;  %v1267_v9 = vld [vmem:[%s1616_s0 + $0xc0] sm:$0xff]   ;;  %v1271_v11 = vld [vmem:[%s1616_s0 + $0xd0] sm:$0xff]   ;;  %v1256_v12 = vld [vmem:[%s1616_s0 + $0x28] sm:$0xff]  }
   0x5   :  { %1239 = vmatprep.subr.bf16.mxu1 %v1249_v1  ;;  %1206 = vmatprep.mubr.msk.bf16.mxu1 %vm277_vm0, %v1267_v9  ;;  %v1257_v13 = vld [vmem:[%s1616_s0 + $0x30] sm:$0xff]   ;;  %v1272_v14 = vld [vmem:[%s1616_s0 + $0xd8] sm:$0xff]   ;;  %v1275_v15 = vld [vmem:[%s1616_s0 + $0xe0] sm:$0xff]  }
   0x6   :  { %v1258_v16 = vld [vmem:[%s1616_s0 + $0x38] sm:$0xff]   ;;  %v1259_v17 = vld [vmem:[%s1616_s0 + $0x40] sm:$0xff]   ;;  %v1276_v18 = vld [vmem:[%s1616_s0 + $0xe8] sm:$0xff]  }
   0x7   :  { %1155 = vmatpush3.bf16.msra.mxu0 %v1249_v1  ;;  %1242 = vmatpush3.bf16.msra.mxu1 %v1249_v1  ;;  %v1279_v19 = vld [vmem:[%s1616_s0 + $0xf0] sm:$0xff]   ;;  %v1260_v20 = vld [vmem:[%s1616_s0 + $0x48] sm:$0xff]   ;;  %v1280_v21 = vld [vmem:[%s1616_s0 + $0xf8] sm:$0xff]  }
   0x8   :  { %1244 = vmatprep.subr.msk.bf16.mxu0 %vm374_vm1, %v1250_v2  ;;  %1245 = vmatprep.subr.msk.bf16.mxu1 %vm374_vm1, %v1250_v2  ;;  %v1261_v22 = vld [vmem:[%s1616_s0 + $0x50] sm:$0xff]   ;;  %v1262_v23 = vld [vmem:[%s1616_s0 + $0x58] sm:$0xff]   ;;  %v1263_v24 = vld [vmem:[%s1616_s0 + $0x60] sm:$0xff]  }
   0x9   :  { %v1264_v25 = vld [vmem:[%s1616_s0 + $0x68] sm:$0xff]   ;;  %v1265_v26 = vld [vmem:[%s1616_s0 + $0x70] sm:$0xff]   ;;  %v1266_v27 = vld [vmem:[%s1616_s0 + $0x78] sm:$0xff]  }
   0xa   :  { %v1269_v28 = vld [vmem:[%s1616_s0 + $0x80] sm:$0xff]   ;;  %v1270_v29 = vld [vmem:[%s1616_s0 + $0x88] sm:$0xff]   ;;  %v1273_v30 = vld [vmem:[%s1616_s0 + $0x90] sm:$0xff]  }
   0xb   :  { %1157 = vmatpush3.bf16.msra.mxu0 %v376_v4  ;;  %1243 = vmatpush3.bf16.msra.mxu1 %v376_v4  ;;  %v1274_v31 = vld [vmem:[%s1616_s0 + $0x98] sm:$0xff]   ;;  %v1277_v32 = vld [vmem:[%s1616_s0 + $0xa0] sm:$0xff]   ;;  %v1278_v33 = vld [vmem:[%s1616_s0 + $0xa8] sm:$0xff]  }
   0xc   :  { %v1281_v34 = vld [vmem:[%s1616_s0 + $0xb0] sm:$0xff]   ;;  %v1282_v35 = vld [vmem:[%s1616_s0 + $0xb8] sm:$0xff]   ;;  %v1458_v36 = vld [vmem:[%s1617_s1] sm:$0xff] }
   0xd   :  { %v1056_v37 = vcombine.high %v1458_v36, %v1458_v36  ;;  %v1465_v38 = vld [vmem:[%s1618_s3] ss:$0 sm:$0xff] }
   0xe   :  { %1159 = vmatmul.mubr.msk.bf16.vlgmr.msra.gmra.mrb[0].mxu0 %vm277_vm0, %v1252_v5  ;;  %1207 = vmatmul.mubr.msk.bf16.vlgmr.msra.gmra.mrb[0].mxu1 %vm277_vm0, %v1268_v10 }
   0xf   :  { %1162 = vmatprep.mubr.msk.bf16.mxu0 %vm277_vm0, %v1253_v6  ;;  %1210 = vmatprep.mubr.msk.bf16.mxu1 %vm277_vm0, %v1271_v11 }
  0x16   :  { %1163 = vmatmul.mubr.msk.bf16.gmra.mrb[4].mxu0 %vm277_vm0, %v1254_v7  ;;  %1211 = vmatmul.mubr.msk.bf16.gmra.mrb[4].mxu1 %vm277_vm0, %v1272_v14 }
  0x17   :  { %1166 = vmatprep.mubr.msk.bf16.mxu0 %vm277_vm0, %v1255_v8  ;;  %1214 = vmatprep.mubr.msk.bf16.mxu1 %vm277_vm0, %v1275_v15 }
  0x1e   :  { %1167 = vmatmul.mubr.msk.bf16.gmra.mrb[8].mxu0 %vm277_vm0, %v1256_v12  ;;  %1215 = vmatmul.mubr.msk.bf16.gmra.mrb[8].mxu1 %vm277_vm0, %v1276_v18 }
  0x1f   :  { %1170 = vmatprep.mubr.msk.bf16.mxu0 %vm277_vm0, %v1257_v13  ;;  %1218 = vmatprep.mubr.msk.bf16.mxu1 %vm277_vm0, %v1279_v19 }
  0x26   :  { %1171 = vmatmul.mubr.msk.bf16.gmra.mrb[12].mxu0 %vm277_vm0, %v1258_v16  ;;  %1219 = vmatmul.mubr.msk.bf16.gmra.mrb[12].mxu1 %vm277_vm0, %v1280_v21 }
  0x27   :  { %1174 = vmatprep.mubr.msk.bf16.mxu0 %vm277_vm0, %v1259_v17  ;;  %811 = vmatprep.mubr.bf16.mxu1 %v1056_v37 }
  0x2e   :  { %1175 = vmatmul.mubr.msk.bf16.gmra.mrb[16].mxu0 %vm277_vm0, %v1260_v20 }
  0x2f   :  { %1178 = vmatprep.mubr.msk.bf16.mxu0 %vm277_vm0, %v1261_v22 }
  0x36   :  { %1179 = vmatmul.mubr.msk.bf16.gmra.mrb[20].mxu0 %vm277_vm0, %v1262_v23 }
  0x37   :  { %1182 = vmatprep.mubr.msk.bf16.mxu0 %vm277_vm0, %v1263_v24 }
  0x3e   :  { %1183 = vmatmul.mubr.msk.bf16.gmra.mrb[24].mxu0 %vm277_vm0, %v1264_v25 }
  0x3f   :  { %1186 = vmatprep.mubr.msk.bf16.mxu0 %vm277_vm0, %v1265_v26 }
  0x46   :  { %1187 = vmatmul.mubr.msk.bf16.gmra.mrb[28].mxu0 %vm277_vm0, %v1266_v27 }
  0x47   :  { %1190 = vmatprep.mubr.msk.bf16.mxu0 %vm277_vm0, %v1269_v28 }
  0x4e   :  { %1191 = vmatmul.mubr.msk.bf16.gmra.mrb[32].mxu0 %vm277_vm0, %v1270_v29 }
  0x4f   :  { %1194 = vmatprep.mubr.msk.bf16.mxu0 %vm277_vm0, %v1273_v30 }
  0x56   :  { %1195 = vmatmul.mubr.msk.bf16.gmra.mrb[36].mxu0 %vm277_vm0, %v1274_v31 }
  0x57   :  { %1198 = vmatprep.mubr.msk.bf16.mxu0 %vm277_vm0, %v1277_v32 }
  0x5e   :  { %1199 = vmatmul.mubr.msk.bf16.gmra.mrb[40].mxu0 %vm277_vm0, %v1278_v33 }
  0x5f   :  { %1202 = vmatprep.mubr.msk.bf16.mxu0 %vm277_vm0, %v1281_v34 }
  0x66   :  { %1203 = vmatmul.mubr.msk.bf16.gmra.mrb[44].mxu0 %vm277_vm0, %v1282_v35 }
  0xe1   :  { %v1160_v39 = vpop.f32.mrb[0].mxu0  ;;  %v1208_v54 = vpop.f32.mrb[0].mxu1 }
  0xe2   :  { %v421_v40 = vadd.f32 %v1160_v39, %v1465_v38  ;;  %v412_v41 = vpop.f32.mrb[1].mxu0  ;;  %v613_v57 = vadd.f32 %v1208_v54, %v1465_v38  ;;  %v604_v58 = vpop.f32.mrb[1].mxu1 }
  0xe3   :  { %v413_v42 = vadd.f32 %v1465_v38, %v412_v41  ;;  %v1161_v43 = vpop.f32.mrb[2].mxu0  ;;  %v605_v61 = vadd.f32 %v1465_v38, %v604_v58  ;;  %v1209_v62 = vpop.f32.mrb[2].mxu1 }
  0xe4   :  { %v424_v44 = vadd.f32 %v1161_v43, %v1465_v38  ;;  %v415_v45 = vpop.f32.mrb[3].mxu0  ;;  %v669_v47 = vmax.f32 %v421_v40, 0.0  ;;  %v717_v1 = vmax.f32 %v613_v57, 0.0  ;;  %v616_v2 = vadd.f32 %v1209_v62, %v1465_v38  ;;  %v607_v3 = vpop.f32.mrb[3].mxu1 }
  0xe5   :  { %v416_v46 = vadd.f32 %v1465_v38, %v415_v45  ;;  %v667_v49 = vmax.f32 %v413_v42, 0.0  ;;  %v715_v5 = vmax.f32 %v605_v61, 0.0  ;;  %v608_v6 = vadd.f32 %v1465_v38, %v607_v3 }
  0xe6   :  { %v670_v48 = vmax.f32 %v424_v44, 0.0  ;;  %v718_v9 = vmax.f32 %v616_v2, 0.0 }
  0xe7   :  { %v668_v50 = vmax.f32 %v416_v46, 0.0  ;;  %v716_v12 = vmax.f32 %v608_v6, 0.0 }
  0xe8   :  { %v1471_v51 = vpack.c.bf16 %v670_v48, %v669_v47  ;;  %v1485_v14 = vpack.c.bf16 %v718_v9, %v717_v1 }
  0xe9   :  { %v1473_v52 = vpack.c.bf16 %v668_v50, %v667_v49  ;;  %v1164_v53 = vpop.f32.mrb[4].mxu0  ;;  %v1489_v17 = vpack.c.bf16 %v716_v12, %v715_v5  ;;  %v1212_v18 = vpop.f32.mrb[4].mxu1 }
  0xea   :  { %v437_v55 = vadd.f32 %v1164_v53, %v1465_v38  ;;  %v428_v56 = vpop.f32.mrb[5].mxu0  ;;  %v629_v21 = vadd.f32 %v1212_v18, %v1465_v38  ;;  %v620_v22 = vpop.f32.mrb[5].mxu1 }
  0xeb   :  { %v429_v59 = vadd.f32 %v1465_v38, %v428_v56  ;;  %v1165_v60 = vpop.f32.mrb[6].mxu0  ;;  %v621_v25 = vadd.f32 %v1465_v38, %v620_v22  ;;  %v1213_v26 = vpop.f32.mrb[6].mxu1 }
  0xec   :  { %v440_v63 = vadd.f32 %v1165_v60, %v1465_v38  ;;  %v431_v0 = vpop.f32.mrb[7].mxu0  ;;  %v673_v7 = vmax.f32 %v437_v55, 0.0  ;;  %v721_v29 = vmax.f32 %v629_v21, 0.0  ;;  %v632_v30 = vadd.f32 %v1213_v26, %v1465_v38  ;;  %v623_v31 = vpop.f32.mrb[7].mxu1 }
  0xed   :  { %v432_v4 = vadd.f32 %v1465_v38, %v431_v0  ;;  %v671_v10 = vmax.f32 %v429_v59, 0.0  ;;  %v719_v33 = vmax.f32 %v621_v25, 0.0  ;;  %v624_v34 = vadd.f32 %v1465_v38, %v623_v31 }
  0xee   :  { %v674_v8 = vmax.f32 %v440_v63, 0.0  ;;  %v722_v39 = vmax.f32 %v632_v30, 0.0 }
  0xef   :  { %v672_v11 = vmax.f32 %v432_v4, 0.0  ;;  %v720_v42 = vmax.f32 %v624_v34, 0.0 }
  0xf0   :  { %v1483_v13 = vpack.c.bf16 %v674_v8, %v673_v7  ;;  %v1501_v44 = vpack.c.bf16 %v722_v39, %v721_v29 }
  0xf1   :  { %v1487_v15 = vpack.c.bf16 %v672_v11, %v671_v10  ;;  %v1168_v16 = vpop.f32.mrb[8].mxu0  ;;  %v1505_v47 = vpack.c.bf16 %v720_v42, %v719_v33  ;;  %v1216_v48 = vpop.f32.mrb[8].mxu1 }
  0xf2   :  { %v453_v19 = vadd.f32 %v1168_v16, %v1465_v38  ;;  %v444_v20 = vpop.f32.mrb[9].mxu0  ;;  %v645_v53 = vadd.f32 %v1216_v48, %v1465_v38  ;;  %v636_v54 = vpop.f32.mrb[9].mxu1 }
  0xf3   :  { %v445_v23 = vadd.f32 %v1465_v38, %v444_v20  ;;  %v1169_v24 = vpop.f32.mrb[10].mxu0  ;;  %v637_v57 = vadd.f32 %v1465_v38, %v636_v54  ;;  %v1217_v58 = vpop.f32.mrb[10].mxu1 }
  0xf4   :  { %v456_v27 = vadd.f32 %v1169_v24, %v1465_v38  ;;  %v447_v28 = vpop.f32.mrb[11].mxu0  ;;  %v677_v35 = vmax.f32 %v453_v19, 0.0  ;;  %v725_v61 = vmax.f32 %v645_v53, 0.0  ;;  %v648_v62 = vadd.f32 %v1217_v58, %v1465_v38  ;;  %v639_v63 = vpop.f32.mrb[11].mxu1 }
  0xf5   :  { %v448_v32 = vadd.f32 %v1465_v38, %v447_v28  ;;  %v675_v40 = vmax.f32 %v445_v23, 0.0  ;;  %v723_v1 = vmax.f32 %v637_v57, 0.0  ;;  %v640_v2 = vadd.f32 %v1465_v38, %v639_v63 }
  0xf6   :  { %v678_v37 = vmax.f32 %v456_v27, 0.0  ;;  %v726_v5 = vmax.f32 %v648_v62, 0.0 }
  0xf7   :  { %v676_v41 = vmax.f32 %v448_v32, 0.0  ;;  %v724_v8 = vmax.f32 %v640_v2, 0.0 }
  0xf8   :  { %v1499_v43 = vpack.c.bf16 %v678_v37, %v677_v35  ;;  %v1517_v10 = vpack.c.bf16 %v726_v5, %v725_v61 }
  0xf9   :  { %v1503_v45 = vpack.c.bf16 %v676_v41, %v675_v40  ;;  %v1172_v46 = vpop.f32.mrb[12].mxu0  ;;  %v1521_v16 = vpack.c.bf16 %v724_v8, %v723_v1  ;;  %v1220_v18 = vpop.f32.mrb[12].mxu1 }
  0xfa   :  { %v469_v49 = vadd.f32 %v1172_v46, %v1465_v38  ;;  %v460_v50 = vpop.f32.mrb[13].mxu0  ;;  %v661_v21 = vadd.f32 %v1220_v18, %v1465_v38  ;;  %v652_v22 = vpop.f32.mrb[13].mxu1 }
  0xfb   :  { %v461_v55 = vadd.f32 %v1465_v38, %v460_v50  ;;  %v1173_v56 = vpop.f32.mrb[14].mxu0  ;;  %v653_v25 = vadd.f32 %v1465_v38, %v652_v22  ;;  %v1221_v26 = vpop.f32.mrb[14].mxu1 }
  0xfc   :  { %v472_v59 = vadd.f32 %v1173_v56, %v1465_v38  ;;  %v463_v60 = vpop.f32.mrb[15].mxu0  ;;  %v681_v3 = vmax.f32 %v469_v49, 0.0  ;;  %v729_v29 = vmax.f32 %v661_v21, 0.0  ;;  %v664_v30 = vadd.f32 %v1221_v26, %v1465_v38  ;;  %v655_v31 = vpop.f32.mrb[15].mxu1 }
  0xfd   :  { %v464_v0 = vadd.f32 %v1465_v38, %v463_v60  ;;  %v679_v6 = vmax.f32 %v461_v55, 0.0  ;;  %v727_v33 = vmax.f32 %v653_v25, 0.0  ;;  %v656_v34 = vadd.f32 %v1465_v38, %v655_v31 }
  0xfe   :  { %v682_v4 = vmax.f32 %v472_v59, 0.0  ;;  %v730_v39 = vmax.f32 %v664_v30, 0.0 }
  0xff   :  { %v680_v7 = vmax.f32 %v464_v0, 0.0  ;;  %v728_v42 = vmax.f32 %v656_v34, 0.0 }
 0x100   :  { %v1515_v9 = vpack.c.bf16 %v682_v4, %v681_v3  ;;  %v1531_v48 = vpack.c.bf16 %v730_v39, %v729_v29 }
 0x101   :  { %v1519_v11 = vpack.c.bf16 %v680_v7, %v679_v6  ;;  %v1176_v12 = vpop.f32.mrb[16].mxu0  ;;  %v1533_v53 = vpack.c.bf16 %v728_v42, %v727_v33 }
 0x102   :  { %v485_v19 = vadd.f32 %v1176_v12, %v1465_v38  ;;  %v476_v20 = vpop.f32.mrb[17].mxu0 }
 0x103   :  { %v477_v23 = vadd.f32 %v1465_v38, %v476_v20  ;;  %v1177_v24 = vpop.f32.mrb[18].mxu0 }
 0x104   :  { %v488_v27 = vadd.f32 %v1177_v24, %v1465_v38  ;;  %v479_v28 = vpop.f32.mrb[19].mxu0  ;;  %v685_v35 = vmax.f32 %v485_v19, 0.0 }
 0x105   :  { %v480_v32 = vadd.f32 %v1465_v38, %v479_v28  ;;  %v683_v40 = vmax.f32 %v477_v23, 0.0 }
 0x106   :  { %v686_v37 = vmax.f32 %v488_v27, 0.0 }
 0x107   :  { %v684_v41 = vmax.f32 %v480_v32, 0.0 }
 0x108   :  { %v742_v46 = vpack.c.bf16 %v686_v37, %v685_v35 }
 0x109   :  { %v741_v49 = vpack.c.bf16 %v684_v41, %v683_v40  ;;  %v1180_v50 = vpop.f32.mrb[20].mxu0 }
 0x10a   :  { %v501_v54 = vadd.f32 %v1180_v50, %v1465_v38  ;;  %v492_v55 = vpop.f32.mrb[21].mxu0 }
 0x10b   :  { %v493_v56 = vadd.f32 %v1465_v38, %v492_v55  ;;  %v1181_v57 = vpop.f32.mrb[22].mxu0  ;;  %1102 = vmatprep.subr.bf16.mxu1 %v741_v49 }
 0x10c   :  { %v504_v58 = vadd.f32 %v1181_v57, %v1465_v38  ;;  %v495_v59 = vpop.f32.mrb[23].mxu0  ;;  %1103 = vmatpush3.bf16.msra.mxu1 %v1473_v52  ;;  %v689_v61 = vmax.f32 %v501_v54, 0.0 }
 0x10d   :  { %v496_v60 = vadd.f32 %v1465_v38, %v495_v59  ;;  %1104 = vmatprep.subr.bf16.mxu1 %v742_v46  ;;  %v687_v63 = vmax.f32 %v493_v56, 0.0  ;;  %v1055_v56 = vcombine.low %v1458_v36, %v1458_v36 }
 0x10e   :  { %v690_v62 = vmax.f32 %v504_v58, 0.0 }
 0x10f   :  { %v688_v0 = vmax.f32 %v496_v60, 0.0 }
 0x110   :  { %v744_v1 = vpack.c.bf16 %v690_v62, %v689_v61  ;;  %1105 = vmatpush3.bf16.msra.mxu1 %v1471_v51 }
 0x111   :  { %v743_v2 = vpack.c.bf16 %v688_v0, %v687_v63  ;;  %v1184_v3 = vpop.f32.mrb[24].mxu0 }
 0x112   :  { %v517_v4 = vadd.f32 %v1184_v3, %v1465_v38  ;;  %v508_v5 = vpop.f32.mrb[25].mxu0 }
 0x113   :  { %v509_v6 = vadd.f32 %v1465_v38, %v508_v5  ;;  %v1185_v7 = vpop.f32.mrb[26].mxu0  ;;  %1106 = vmatprep.subr.bf16.mxu1 %v743_v2 }
 0x114   :  { %v520_v52 = vadd.f32 %v1185_v7, %v1465_v38  ;;  %v511_v8 = vpop.f32.mrb[27].mxu0  ;;  %1107 = vmatpush3.bf16.msra.mxu1 %v1487_v15  ;;  %v693_v18 = vmax.f32 %v517_v4, 0.0 }
 0x115   :  { %v512_v12 = vadd.f32 %v1465_v38, %v511_v8  ;;  %1108 = vmatprep.subr.bf16.mxu1 %v744_v1  ;;  %v691_v51 = vmax.f32 %v509_v6, 0.0 }
 0x116   :  { %v694_v19 = vmax.f32 %v520_v52, 0.0 }
 0x117   :  { %v692_v20 = vmax.f32 %v512_v12, 0.0 }
 0x118   :  { %v746_v21 = vpack.c.bf16 %v694_v19, %v693_v18  ;;  %1109 = vmatpush3.bf16.msra.mxu1 %v1483_v13 }
 0x119   :  { %v745_v22 = vpack.c.bf16 %v692_v20, %v691_v51  ;;  %v1188_v23 = vpop.f32.mrb[28].mxu0 }
 0x11a   :  { %v533_v24 = vadd.f32 %v1188_v23, %v1465_v38  ;;  %v524_v25 = vpop.f32.mrb[29].mxu0 }
 0x11b   :  { %v525_v26 = vadd.f32 %v1465_v38, %v524_v25  ;;  %v1189_v27 = vpop.f32.mrb[30].mxu0  ;;  %1110 = vmatprep.subr.bf16.mxu1 %v745_v22 }
 0x11c   :  { %v536_v15 = vadd.f32 %v1189_v27, %v1465_v38  ;;  %v527_v28 = vpop.f32.mrb[31].mxu0  ;;  %1111 = vmatpush3.bf16.msra.mxu1 %v1503_v45  ;;  %v697_v30 = vmax.f32 %v533_v24, 0.0 }
 0x11d   :  { %v528_v29 = vadd.f32 %v1465_v38, %v527_v28  ;;  %1112 = vmatprep.subr.bf16.mxu1 %v746_v21  ;;  %v695_v13 = vmax.f32 %v525_v26, 0.0 }
 0x11e   :  { %v698_v31 = vmax.f32 %v536_v15, 0.0 }
 0x11f   :  { %v696_v32 = vmax.f32 %v528_v29, 0.0 }
 0x120   :  { %v748_v33 = vpack.c.bf16 %v698_v31, %v697_v30  ;;  %1113 = vmatpush3.bf16.msra.mxu1 %v1499_v43  ;;  %v1561_v43 = vld [vmem:[%s1617_s1 + $0x8] sm:$0xff] }
 0x121   :  { %v747_v34 = vpack.c.bf16 %v696_v32, %v695_v13  ;;  %v1192_v35 = vpop.f32.mrb[32].mxu0 }
 0x122   :  { %v549_v37 = vadd.f32 %v1192_v35, %v1465_v38  ;;  %v540_v39 = vpop.f32.mrb[33].mxu0 }
 0x123   :  { %v541_v40 = vadd.f32 %v1465_v38, %v540_v39  ;;  %v1193_v41 = vpop.f32.mrb[34].mxu0  ;;  %1114 = vmatprep.subr.bf16.mxu1 %v747_v34  ;;  %v1057_v34 = vcombine.low %v1561_v43, %v1561_v43 }
 0x124   :  { %v701_v45 = vmax.f32 %v549_v37, 0.0  ;;  %v552_v42 = vadd.f32 %v1193_v41, %v1465_v38  ;;  %v543_v46 = vpop.f32.mrb[35].mxu0  ;;  %1115 = vmatpush3.bf16.msra.mxu1 %v1519_v11  ;;  %v1058_v11 = vcombine.high %v1561_v43, %v1561_v43 }
 0x125   :  { %v544_v49 = vadd.f32 %v1465_v38, %v543_v46  ;;  %1116 = vmatprep.subr.bf16.mxu1 %v748_v33  ;;  %v699_v54 = vmax.f32 %v541_v40, 0.0 }
 0x126   :  { %v702_v50 = vmax.f32 %v552_v42, 0.0 }
 0x127   :  { %v700_v55 = vmax.f32 %v544_v49, 0.0 }
 0x128   :  { %v750_v57 = vpack.c.bf16 %v702_v50, %v701_v45  ;;  %1117 = vmatpush3.bf16.msra.mxu1 %v1515_v9 }
 0x129   :  { %v749_v58 = vpack.c.bf16 %v700_v55, %v699_v54  ;;  %v1196_v59 = vpop.f32.mrb[36].mxu0  ;;  %1124 = vmatprep.subr.bf16.mxu1 %v1489_v17  ;;  %v1289_v54 = vld [vmem:[%s1615_s2 + $0x28] sm:$0xff]  }
 0x12a   :  { %v565_v60 = vadd.f32 %v1196_v59, %v1465_v38  ;;  %v556_v61 = vpop.f32.mrb[37].mxu0 }
 0x12b   :  { %v557_v62 = vadd.f32 %v1465_v38, %v556_v61  ;;  %v1197_v63 = vpop.f32.mrb[38].mxu0  ;;  %812 = vmatmul.mubr.bf16.vlgmr.msra.gmra.mrb[16].mxu1 %v1055_v56  ;;  %v1290_v56 = vld [vmem:[%s1615_s2 + $0x30] sm:$0xff]  }
 0x12c   :  { %v705_v0 = vmax.f32 %v565_v60, 0.0  ;;  %v568_v36 = vadd.f32 %v1197_v63, %v1465_v38  ;;  %v559_v1 = vpop.f32.mrb[39].mxu0  ;;  %1125 = vmatpush3.bf16.msra.mxu1 %v749_v58  ;;  %851 = vmatprep.mubr.bf16.mxu1 %v1058_v11 }
 0x12d   :  { %v560_v9 = vadd.f32 %v1465_v38, %v559_v1  ;;  %1126 = vmatprep.subr.bf16.mxu1 %v1485_v14  ;;  %v703_v3 = vmax.f32 %v557_v62, 0.0 }
 0x12e   :  { %v706_v2 = vmax.f32 %v568_v36, 0.0 }
 0x12f   :  { %v704_v17 = vmax.f32 %v560_v9, 0.0 }
 0x130   :  { %v752_v4 = vpack.c.bf16 %v706_v2, %v705_v0  ;;  %1127 = vmatpush3.bf16.msra.mxu1 %v750_v57  ;;  %v1059_v57 = vld [vmem:[%s1618_s3 + $0x1] ss:$0 sm:$0xff]  ;;  %v1063_v0 = vld [vmem:[%s1618_s3 + $0x2] ss:$0 sm:$0xff] }
 0x131   :  { %v751_v5 = vpack.c.bf16 %v704_v17, %v703_v3  ;;  %v1200_v6 = vpop.f32.mrb[40].mxu0  ;;  %1128 = vmatprep.subr.bf16.mxu1 %v1505_v47 }
 0x132   :  { %v581_v7 = vadd.f32 %v1200_v6, %v1465_v38  ;;  %v572_v52 = vpop.f32.mrb[41].mxu0 }
 0x133   :  { %v573_v8 = vadd.f32 %v1465_v38, %v572_v52  ;;  %v1201_v12 = vpop.f32.mrb[42].mxu0 }
 0x134   :  { %v709_v18 = vmax.f32 %v581_v7, 0.0  ;;  %v584_v19 = vadd.f32 %v1201_v12, %v1465_v38  ;;  %v575_v51 = vpop.f32.mrb[43].mxu0  ;;  %1129 = vmatpush3.bf16.msra.mxu1 %v751_v5 }
 0x135   :  { %v576_v14 = vadd.f32 %v1465_v38, %v575_v51  ;;  %1130 = vmatprep.subr.bf16.mxu1 %v1501_v44  ;;  %v707_v21 = vmax.f32 %v573_v8, 0.0 }
 0x136   :  { %v710_v20 = vmax.f32 %v584_v19, 0.0 }
 0x137   :  { %v708_v22 = vmax.f32 %v576_v14, 0.0 }
 0x138   :  { %v754_v23 = vpack.c.bf16 %v710_v20, %v709_v18  ;;  %1131 = vmatpush3.bf16.msra.mxu1 %v752_v4 }
 0x139   :  { %v753_v47 = vpack.c.bf16 %v708_v22, %v707_v21  ;;  %v1204_v24 = vpop.f32.mrb[44].mxu0  ;;  %1132 = vmatprep.subr.bf16.mxu1 %v1521_v16 }
 0x13a   :  { %v597_v25 = vadd.f32 %v1204_v24, %v1465_v38  ;;  %v588_v26 = vpop.f32.mrb[45].mxu0 }
 0x13b   :  { %v589_v27 = vadd.f32 %v1465_v38, %v588_v26  ;;  %v1205_v15 = vpop.f32.mrb[46].mxu0 }
 0x13c   :  { %v713_v28 = vmax.f32 %v597_v25, 0.0  ;;  %v600_v29 = vadd.f32 %v1205_v15, %v1465_v38  ;;  %v591_v30 = vpop.f32.mrb[47].mxu0  ;;  %1133 = vmatpush3.bf16.msra.mxu1 %v753_v47 }
 0x13d   :  { %v592_v44 = vadd.f32 %v1465_v38, %v591_v30  ;;  %1134 = vmatprep.subr.bf16.mxu1 %v1517_v10  ;;  %v711_v13 = vmax.f32 %v589_v27, 0.0  ;;  %v1287_v38 = vld [vmem:[%s1615_s2 + $0x18] sm:$0xff]   ;;  %v1291_v10 = vmov 0.0  }
 0x13e   :  { %v714_v31 = vmax.f32 %v600_v29, 0.0 }
 0x13f   :  { %v712_v32 = vmax.f32 %v592_v44, 0.0 }
 0x140   :  { %v756_v33 = vpack.c.bf16 %v714_v31, %v713_v28  ;;  %1135 = vmatpush3.bf16.msra.mxu1 %v754_v23 }
 0x141   :  { %v755_v16 = vpack.c.bf16 %v712_v32, %v711_v13  ;;  %1136 = vmatprep.subr.bf16.mxu1 %v1533_v53  ;;  %v1288_v53 = vld [vmem:[%s1615_s2 + $0x20] sm:$0xff]  }
 0x144   :  { %1137 = vmatpush3.bf16.msra.mxu1 %v755_v16 }
 0x145   :  { %1138 = vmatprep.subr.bf16.mxu1 %v1531_v48 }
 0x148   :  { %1139 = vmatpush3.bf16.msra.mxu1 %v756_v33 }
 0x149   :  { %1222 = vmatprep.subr.bf16.mxu1 %v1291_v10 }
 0x14b   :  { %852 = vmatmul.mubr.bf16.vlgmr.msra.gmra.mrb[20].mxu1 %v1057_v34 }
 0x14c   :  { %1223 = vmatpush3.bf16.msra.mxu1 %v1287_v38  ;;  %1226 = vmatprep.mubr.msk.bf16.mxu1 %vm1292_vm2, %v1291_v10 }
 0x14d   :  { %1224 = vmatprep.subr.bf16.mxu1 %v1291_v10 }
 0x150   :  { %1225 = vmatpush3.bf16.msra.mxu1 %v1288_v53 }
 0x151   :  { %1230 = vmatprep.subr.bf16.mxu1 %v1291_v10 }
 0x1fe   :  { %v1118_v48 = vpop.f32.mrb[16].mxu1 }
 0x1ff   :  { %v1119_v35 = vpop.f32.mrb[17].mxu1 }
 0x200   :  { %v1120_v37 = vadd.f32 %v1119_v35, %v1118_v48  ;;  %v1121_v39 = vpop.f32.mrb[18].mxu1 }
 0x201   :  { %v1122_v40 = vpop.f32.mrb[19].mxu1 }
 0x21e   :  { %v1140_v41 = vpop.f32.mrb[20].mxu1 }
 0x21f   :  { %v1141_v45 = vpop.f32.mrb[21].mxu1 }
 0x220   :  { %v1142_v42 = vadd.f32 %v1141_v45, %v1140_v41  ;;  %v1143_v46 = vpop.f32.mrb[22].mxu1 }
 0x221   :  { %v1144_v49 = vpop.f32.mrb[23].mxu1 }
 0x222   :  { %v854_v43 = vadd.f32 %v1142_v42, %v1120_v37 }
 0x224   :  { %v859_v50 = vmul.f32 0.00390625, %v854_v43 }
 0x226   :  { %v860_v55 = vpack.c.bf16 %v859_v50, %v859_v50 }
 0x228   :  { %1227 = vmatmul.mubr.msk.bf16.vlgmr.msra.gmra.mrb[24].mxu1 %vm877_vm3, %v860_v55 }
 0x229   :  { %1231 = vmatpush3.bf16.msra.mxu1 %v1289_v54  ;;  %1234 = vmatprep.mubr.msk.bf16.mxu1 %vm1292_vm2, %v1291_v10 }
 0x22a   :  { %1232 = vmatprep.subr.bf16.mxu1 %v1291_v10 }
 0x22d   :  { %1233 = vmatpush3.bf16.msra.mxu1 %v1290_v56 }
 0x2fb   :  { %v915_v11 = vpop.f32.mrb[24].mxu1 }
 0x2fc   :  { %v916_v58 = vadd.f32 %v1059_v57, %v915_v11  ;;  %v1228_v59 = vpop.f32.mrb[25].mxu1 }
 0x2fd   :  { %v918_v60 = vpop.f32.mrb[26].mxu1 }
 0x2fe   :  { %v921_v61 = vmax.f32 %v916_v58, 0.0  ;;  %v1229_v62 = vpop.f32.mrb[27].mxu1 }
 0x300   :  { %v922_v63 = vpack.c.bf16 %v921_v61, %v921_v61 }
 0x302   :  { %1235 = vmatmul.mubr.msk.bf16.vlgmr.msra.gmra.mrb[28].mxu1 %vm877_vm3, %v922_v63 }
 0x3d5   :  { %v976_v36 = vpop.f32.mrb[28].mxu1 }
 0x3d6   :  { %v977_v1 = vadd.f32 %v1063_v0, %v976_v36  ;;  %v1236_v9 = vpop.f32.mrb[29].mxu1 }
 0x3d7   :  { %v979_v2 = vpop.f32.mrb[30].mxu1 }
 0x3d8   :  { %982 = vst [vmem:[%s1619_s4] sm:$0xff] %v977_v1  ;;  %v1237_v3 = vpop.f32.mrb[31].mxu1 }

</bundles_post_ra>
